<compile_context>
chip_gen: v7x
topology: tpu7x:2x2x1
jax: 0.10.0
libtpu: 0.0.40
codegen_flags: <defaults>
</compile_context>

<pallas_src>
import jax
import jax.numpy as jnp
from jax.experimental import pallas as pl
from jax.experimental.pallas import tpu as pltpu


def _round_up(x, m):
    return ((x + m - 1) // m) * m


def _pick_tile(total, max_tile, quantum):
    """Largest multiple of `quantum` that divides `total` and is <= max_tile.
    `total` must already be a multiple of `quantum`."""
    t = min(max_tile, total)
    t -= t % quantum
    t = max(t, quantum)
    while total % t:
        t -= quantum
    return t


def _device_kind():
    try:
        return jax.devices()[0].device_kind.lower()
    except Exception:
        return ""


def _softplus(z):
    # PyTorch F.softplus with default beta=1, threshold=20.
    return jnp.where(z > 20.0, z, jnp.log1p(jnp.exp(jnp.minimum(z, 20.0))))


def _netg_fused_kernel(x_ref, w_ref, b_ref, o_ref):
    """Collapsed-K path: one MXU matmul + fused bias/softplus per (i, j) tile."""
    z = jnp.dot(x_ref[...], w_ref[...], preferred_element_type=jnp.float32)
    o_ref[...] = _softplus(z + b_ref[...]).astype(o_ref.dtype)


def _netg_ktiled_kernel(x_ref, w_ref, b_ref, o_ref):
    """K-tiled path: accumulate directly into the resident f32 output tile."""
    k = pl.program_id(2)

    @pl.when(k == 0)
    def _():
        o_ref[...] = jnp.zeros_like(o_ref)

    o_ref[...] += jnp.dot(x_ref[...], w_ref[...],
                          preferred_element_type=jnp.float32)

    @pl.when(k == pl.num_programs(2) - 1)
    def _():
        o_ref[...] = _softplus(o_ref[...] + b_ref[...]).astype(o_ref.dtype)


class NetGOneLayerPallas:
    """softplus(x @ W + b) with W: (L1, L2) (== PyTorch weight.T), b: (L2,)."""

    def __init__(self, w, b, *, tm=512, tn=512, max_tk=2048,
                 use_bf16=False, vmem_limit_bytes=None,
                 allow_jnp_fallback=True):
        w = jnp.asarray(w, jnp.float32)
        b = jnp.asarray(b, jnp.float32)
        L1, L2 = w.shape
        assert b.shape == (L2,)
        self.L1, self.L2 = L1, L2
        self.tm = tm
        self.use_bf16 = use_bf16
        self.allow_jnp_fallback = allow_jnp_fallback
        self._w_orig, self._b_orig = w, b   # kept for the tiny-shape fallback

        kind = _device_kind()
        is_v7 = ("v7" in kind) or ("7x" in kind)
        if vmem_limit_bytes is None:
            # v5e/v6e: 128 MiB physical VMEM -> 64 MiB scoped is comfortable.
            # v7x: 64 MiB physical -> leave headroom at 48 MiB.
            vmem_limit_bytes = (48 if is_v7 else 64) * 1024 * 1024
        self.vmem_limit_bytes = int(vmem_limit_bytes)

        # ---- N (L2 / lane) tiling: lane-dense multiple-of-128 tiles. ----
        L2p = _round_up(L2, 128)
        TN = _pick_tile(L2p, tn, 128)
        if is_v7 and L2p // TN == 1 and L2p >= 256:
            # Two TensorCores on v7x: make sure the "parallel" axes expose
            # at least 2 output tiles so the second core isn't idle.
            TN = _pick_tile(L2p, TN // 2, 128)
        self.L2p, self.TN = L2p, TN

        # ---- K (L1 / reduction) handling, sized against the VMEM budget. ----
        in_itemsize = 2 if use_bf16 else 4
        budget = int(0.75 * self.vmem_limit_bytes)        # headroom for temps
        fixed = 2 * (tm * TN * 4 + TN * 4)                # out tile + bias (dbl-buf)
        per_k = 2 * (tm + TN) * in_itemsize               # x + w per K element (dbl-buf)
        k_budget = max(128, (budget - fixed) // per_k)
        self.collapse_k = (L1 <= max_tk) and (L1 <= k_budget)
        if self.collapse_k:
            # Full-extent K block: legal even when L1 is not a multiple of 128,
            # so no K zero-pad and no wasted MXU/DMA work for small L1.
            self.L1p, self.TK = L1, L1
        else:
            self.L1p = _round_up(L1, 128)
            self.TK = _pick_tile(self.L1p, min(max_tk, k_budget), 128)

        # ---- Pad / cast the weights ONCE (hoisted out of the forward path). ----
        in_dtype = jnp.bfloat16 if use_bf16 else jnp.float32
        wp = w
        if (self.L1p, self.L2p) != (L1, L2):
            wp = jnp.pad(wp, ((0, self.L1p - L1), (0, self.L2p - L2)))
        self._wp = wp.astype(in_dtype)
        bp = b if self.L2p == L2 else jnp.pad(b, (0, self.L2p - L2))
        self._bp = bp.reshape(1, self.L2p)                # bias stays f32
        self._in_dtype = in_dtype

    def __call__(self, x):
        x = jnp.asarray(x, jnp.float32)
        B, L1 = x.shape
        assert L1 == self.L1

        # Tiny-shape fallback: fixed pallas_call + padding overhead dominates,
        # XLA's fused matmul+softplus is faster at these sizes.
        if self.allow_jnp_fallback and (B * self.L2 < 128 * 128
                                        and self.L1 <= 256):
            return jax.nn.softplus(x @ self._w_orig + self._b_orig[None, :])

        TM = min(self.tm, _round_up(B, 8))
        Bp = _round_up(B, TM)
        TN, TK, L1p, L2p = self.TN, self.TK, self.L1p, self.L2p

        xp = x
        if (Bp, L1p) != (B, L1):
            # Zero padding is exact for the matmul; padded rows are sliced off.
            xp = jnp.pad(xp, ((0, Bp - B), (0, L1p - L1)))
        xp = xp.astype(self._in_dtype)

        if self.collapse_k:
            grid = (Bp // TM, L2p // TN)
            in_specs = [
                pl.BlockSpec((TM, L1p), lambda i, j: (i, 0)),   # x tile (full K)
                pl.BlockSpec((L1p, TN), lambda i, j: (0, j)),   # w tile (full K)
                pl.BlockSpec((1, TN), lambda i, j: (0, j)),     # bias tile
            ]
            out_specs = pl.BlockSpec((TM, TN), lambda i, j: (i, j))
            kernel = _netg_fused_kernel
            dims = ("parallel", "parallel")
        else:
            grid = (Bp // TM, L2p // TN, L1p // TK)
            in_specs = [
                pl.BlockSpec((TM, TK), lambda i, j, k: (i, k)),
                pl.BlockSpec((TK, TN), lambda i, j, k: (k, j)),
                pl.BlockSpec((1, TN), lambda i, j, k: (0, j)),
            ]
            out_specs = pl.BlockSpec((TM, TN), lambda i, j, k: (i, j))
            kernel = _netg_ktiled_kernel
            dims = ("parallel", "parallel", "arbitrary")

        out = pl.pallas_call(
            kernel,
            out_shape=jax.ShapeDtypeStruct((Bp, L2p), jnp.float32),
            grid_spec=pltpu.PrefetchScalarGridSpec(
                num_scalar_prefetch=0,
                grid=grid,
                in_specs=in_specs,
                out_specs=out_specs,
            ),
            compiler_params=pltpu.CompilerParams(
                dimension_semantics=dims,
                vmem_limit_bytes=self.vmem_limit_bytes,
            ),
        )(xp, self._wp, self._bp)

        return out[:B, :self.L2]


def netg_onelayer_forward(x, w, b, **kwargs):
    """Functional one-shot wrapper (weights re-prepared per call)."""
    return NetGOneLayerPallas(w, b, **kwargs)(x)


if __name__ == "__main__":
    key = jax.random.PRNGKey(0)

    def make_case(k, B, L1, L2):
        kx, kw, kb = jax.random.split(k, 3)
        bound = 1.0 / (L1 ** 0.5)     # PyTorch nn.Linear default init scale
        x = jax.random.normal(kx, (B, L1), dtype=jnp.float32)
        w = jax.random.uniform(kw, (L1, L2), minval=-bound, maxval=bound,
                               dtype=jnp.float32)   # (L1, L2) == weight.T
        b = jax.random.uniform(kb, (L2,), minval=-bound, maxval=bound,
                               dtype=jnp.float32)
        return x, w, b

    def ref_fwd(x, w, b):
        return jax.nn.softplus(x @ w + b[None, :])

    keys = jax.random.split(key, 3)

    # Case 1: tiny module-like shape (B=6, L1=32, L2=96).
    # Forces the Pallas collapsed-K kernel (fallback disabled) -> exercises
    # row padding, full-extent K block, lane padding of W/b.
    x, w, b = make_case(keys[0], 6, 32, 96)
    mod = NetGOneLayerPallas(w, b, allow_jnp_fallback=False)
    out = jax.block_until_ready(mod(x))
    assert out.shape == (6, 96)
    assert jnp.allclose(out, ref_fwd(x, w, b), atol=1e-5, rtol=1e-5)

    # Case 1b: same weights through the default tiny-shape jnp fallback path.
    out_fb = jax.block_until_ready(NetGOneLayerPallas(w, b)(x))
    assert jnp.allclose(out_fb, ref_fwd(x, w, b), atol=1e-5, rtol=1e-5)

    # Case 2: non-tile-aligned medium shape, collapsed-K, f32 (1e-5 parity).
    x, w, b = make_case(keys[1], 200, 160, 384)
    mod = NetGOneLayerPallas(w, b, allow_jnp_fallback=False)
    out = jax.block_until_ready(mod(x))
    assert jnp.allclose(out, ref_fwd(x, w, b), atol=1e-5, rtol=1e-5)

    # Case 2b: same shape with bf16 MXU operands (f32 accumulate), looser tol.
    mod_bf16 = NetGOneLayerPallas(w, b, use_bf16=True, allow_jnp_fallback=False)
    out_bf16 = jax.block_until_ready(mod_bf16(x))
    assert jnp.allclose(out_bf16, ref_fwd(x, w, b), atol=5e-2, rtol=5e-2)

    # Case 3: force the K-tiled kernel (accumulate into the resident output
    # tile) by capping max_tk below L1.
    x, w, b = make_case(keys[2], 64, 256, 256)
    mod = NetGOneLayerPallas(w, b, max_tk=128, allow_jnp_fallback=False)
    out = jax.block_until_ready(mod(x))
    assert jnp.allclose(out, ref_fwd(x, w, b), atol=1e-5, rtol=1e-5)

    # TODO(synk): if xprof shows exposed DMA for small-B mem-bound shapes,
    # add pipeline_mode=pl.Buffered(3) on the x/w BlockSpecs.

    print("KERNEL_OK")
</pallas_src>

<mosaic_0001>
module attributes {stable_mosaic.version = 11 : i64} {
  func.func @_netg_fused_kernel(%arg0: i32, %arg1: i32, %arg2: memref<8x32xf32, #tpu.memory_space<vmem>>, %arg3: memref<32x128xf32, #tpu.memory_space<vmem>>, %arg4: memref<1x128xf32, #tpu.memory_space<vmem>>, %arg5: memref<8x128xf32, #tpu.memory_space<vmem>>) attributes {dimension_semantics = [#tpu.dimension_semantics<parallel>, #tpu.dimension_semantics<parallel>], iteration_bounds = array<i64: 1, 1>, scalar_prefetch = 0 : i64, scratch_operands = 0 : i64, tpu.core_type = #tpu.core_type<tc>, window_params = [{transform_indices = @transform_0, window_bounds = array<i64: 8, 32>}, {transform_indices = @transform_1, window_bounds = array<i64: 32, 128>}, {transform_indices = @transform_2, window_bounds = array<i64: 1, 128>}, {transform_indices = @transform_3, window_bounds = array<i64: 8, 128>}]} {
    %c0 = arith.constant 0 : index
    %c0_0 = arith.constant 0 : index
    %0 = vector.load %arg2[%c0, %c0_0] : memref<8x32xf32, #tpu.memory_space<vmem>>, vector<8x32xf32>
    %c0_1 = arith.constant 0 : index
    %c0_2 = arith.constant 0 : index
    %1 = vector.load %arg3[%c0_1, %c0_2] : memref<32x128xf32, #tpu.memory_space<vmem>>, vector<32x128xf32>
    %cst = arith.constant dense<0.000000e+00> : vector<8x128xf32>
    %2 = tpu.matmul %0, %1, %cst {dimension_numbers = #tpu.dot_dimension_numbers<[1], [0], [0], [1], [0, 0, 1, 1], [], []>} : vector<8x32xf32>, vector<32x128xf32>, vector<8x128xf32> -> vector<8x128xf32>
    %c0_3 = arith.constant 0 : index
    %c0_4 = arith.constant 0 : index
    %3 = vector.load %arg4[%c0_3, %c0_4] : memref<1x128xf32, #tpu.memory_space<vmem>>, vector<1x128xf32>
    %4 = vector.broadcast %3 : vector<1x128xf32> to vector<8x128xf32>
    %5 = arith.addf %2, %4 : vector<8x128xf32>
    %cst_5 = arith.constant 2.000000e+01 : f32
    %6 = vector.broadcast %cst_5 : f32 to vector<8x128xf32>
    %7 = arith.cmpf ogt, %5, %6 : vector<8x128xf32>
    %cst_6 = arith.constant 2.000000e+01 : f32
    %8 = vector.broadcast %cst_6 : f32 to vector<8x128xf32>
    %9 = arith.minimumf %5, %8 : vector<8x128xf32>
    %10 = math.exp %9 : vector<8x128xf32>
    %11 = math.log1p %10 : vector<8x128xf32>
    %12 = arith.select %7, %5, %11 : vector<8x128xi1>, vector<8x128xf32>
    %c0_7 = arith.constant 0 : index
    %c0_8 = arith.constant 0 : index
    %13 = vector.load %arg5[%c0_7, %c0_8] : memref<8x128xf32, #tpu.memory_space<vmem>>, vector<8x128xf32>
    tpu.vector_store %arg5[%c0_7, %c0_8], %12 {strides = array<i32>} : memref<8x128xf32, #tpu.memory_space<vmem>>, vector<8x128xf32>,
    return
  }
  func.func @transform_0(%arg0: i32, %arg1: i32) -> (i32, i32) {
    %c0_i32 = arith.constant 0 : i32
    %c0_i32_0 = arith.constant 0 : i32
    return %arg0, %c0_i32 : i32, i32
  }
  func.func @transform_1(%arg0: i32, %arg1: i32) -> (i32, i32) {
    %c0_i32 = arith.constant 0 : i32
    %c0_i32_0 = arith.constant 0 : i32
    return %c0_i32, %arg1 : i32, i32
  }
  func.func @transform_2(%arg0: i32, %arg1: i32) -> (i32, i32) {
    %c0_i32 = arith.constant 0 : i32
    %c0_i32_0 = arith.constant 0 : i32
    return %c0_i32, %arg1 : i32, i32
  }
  func.func @transform_3(%arg0: i32, %arg1: i32) -> (i32, i32) {
    %c0_i32 = arith.constant 0 : i32
    return %arg0, %arg1 : i32, i32
  }
}

</mosaic_0001>

<bundles_post_ra>
// kernel: tpu_custom_call.1
= control target key start
LH: loop header
LB: loop body
LE: loop exit
PB: predicated region body
PF: predicated region fallthrough
CT: control target
= control target key end

     0   :  { %8 = vsyncpa [#allocation3], 0  ;;  %s377_s0 = inlined_call_operand.hbm [shape: f32[8,32], index: 0, kind: input, shape index: {}]   ;;  %s378_s1 = inlined_call_operand.hbm [shape: f32[32,128], index: 1, kind: input, shape index: {}]   ;;  %s379_s2 = inlined_call_operand.hbm [shape: f32[1,128], index: 2, kind: input, shape index: {}]   ;;  %s380_s3 = inlined_call_operand.hbm [shape: f32[8,128], index: 3, kind: output, shape index: {}]  }
   0x1   :  { %9 = vsyncpa [#allocation6], 0 }
   0x2   :  { %10 = vsyncpa [#allocation4], 0  ;;  %s300_s12 = smov [#allocation5]   ;;  %s206_s16 = scalar_lea.hbm %s378_s1, 512 }
   0x3   :  { %s26_s13 = sshll.u32 %s300_s12, 4  ;;  %p207_p0 = scmp.ne.s32.totalorder %s378_s1, %s206_s16  ;;  %s27_s13 = int_to_ptr.vmem [resolvable:$true] %s26_s13 }
   0x4   :  { %p210_p1 = scmp.lt.u32.totalorder %s206_s16, %s378_s1 }
   0x6   :  { %p212_p2 = pnand %p210_p1, %p207_p0 }
   0x8   :  { %215 = shalt.err (!%p212_p2)
}
   0x9   :  { %s216_s21 = scalar_lea.vmem %s27_s13, 512  ;;  %p221_p4 = scmp.lt.s32.totalorder %s27_s13, %s27_s13 }
   0xa   :  { %p217_p3 = scmp.ne.s32.totalorder %s27_s13, %s216_s21  ;;  %p222_p5 = scmp.lt.s32.totalorder %s216_s21, %s216_s21 }
   0xc   :  { %p223_p6 = por %p222_p5, %p221_p4 }
   0xe   :  { %p224_p7 = pnand %p223_p6, %p217_p3 }
  0x10   :  { %227 = shalt.err (!%p224_p7)
}
  0x11   :  { %s301_s22 = smov 128   ;;  %s302_s23 = smov 8  }
  0x12   :  { %32 = dma.hbm_to_vmem [thread:$0]  %s378_s1, 512, %s27_s13, [#allocation6], %s301_s22, %s301_s22, %s302_s23  }
  0x13   :  { %s303_s26 = smov [#allocation2]   ;;  %s304_s28 = smov [#allocation7]  }
  0x14   :  { %s17_s27 = sshll.u32 %s303_s26, 4  ;;  %s39_s29 = sshll.u32 %s304_s28, 4  ;;  %s18_s27 = int_to_ptr.vmem [resolvable:$true] %s17_s27  ;;  %s40_s29 = int_to_ptr.vmem [resolvable:$true] %s39_s29 }
  0x15   :  { %s228_s5 = scalar_lea.hbm %s377_s0, 128 }
  0x16   :  { %p229_p8 = scmp.ne.s32.totalorder %s377_s0, %s228_s5  ;;  %p232_p9 = scmp.lt.u32.totalorder %s228_s5, %s377_s0 }
  0x18   :  { %p234_p10 = pnand %p232_p9, %p229_p8 }
  0x1a   :  { %237 = shalt.err (!%p234_p10)
}
  0x1b   :  { %s238_s1 = scalar_lea.vmem %s18_s27, 128  ;;  %p243_p12 = scmp.lt.s32.totalorder %s18_s27, %s18_s27 }
  0x1c   :  { %p239_p11 = scmp.ne.s32.totalorder %s18_s27, %s238_s1  ;;  %p244_p13 = scmp.lt.s32.totalorder %s238_s1, %s238_s1 }
  0x1e   :  { %p245_p0 = por %p244_p13, %p243_p12 }
  0x20   :  { %p246_p1 = pnand %p245_p0, %p239_p11 }
  0x22   :  { %249 = shalt.err (!%p246_p1)
}
  0x23   :  { %20 = dma.hbm_to_vmem [thread:$0]  %s377_s0, 128, %s18_s27, [#allocation3]  }
  0x24   :  { %s250_s14 = scalar_lea.hbm %s379_s2, 16 }
  0x25   :  { %p251_p2 = scmp.ne.s32.totalorder %s379_s2, %s250_s14  ;;  %p254_p3 = scmp.lt.u32.totalorder %s250_s14, %s379_s2 }
  0x27   :  { %p256_p4 = pnand %p254_p3, %p251_p2 }
  0x29   :  { %259 = shalt.err (!%p256_p4)
}
  0x2a   :  { %s260_s19 = scalar_lea.vmem %s40_s29, 16  ;;  %s264_s20 = scalar_lea.vmem %s40_s29, 32 }
  0x2b   :  { %p261_p5 = scmp.ne.s32.totalorder %s40_s29, %s260_s19  ;;  %p265_p6 = scmp.lt.s32.totalorder %s40_s29, %s40_s29 }
  0x2c   :  { %p266_p7 = scmp.lt.s32.totalorder %s264_s20, %s260_s19 }
  0x2e   :  { %p267_p8 = por %p266_p7, %p265_p6 }
  0x30   :  { %p268_p9 = pnand %p267_p8, %p261_p5 }
  0x32   :  { %271 = shalt.err (!%p268_p9)
}
  0x33   :  { %42 = dma.hbm_to_vmem [thread:$0]  %s379_s2, 16, %s40_s29, [#allocation6]  }
  0x34   :  { %294 = dma.done.wait [#allocation3], 128  }
  0x35   :  { %295 = vsyncadd [#allocation3], 4294967168 }
  0x36   :  { %296 = dma.done.wait [#allocation6], 528  }
  0x37   :  { %297 = vsyncadd [#allocation6], 4294966768  ;;  %v305_v0 = vmov 0.0|0.0   ;;  %vm306_vm0 = vmmov 0   ;;  %v307_v1 = vmov 0.0   ;;  %v53_v2 = vld [vmem:[#allocation5] sm:$0xff] }
  0x38   :  { %187 = vmatprep.subr.bf16.mxu0 %v305_v0  ;;  %184 = vmatprep.mubr.msk.f32.mxu0 %vm306_vm0, %v307_v1  ;;  %v54_v3 = vld [vmem:[#allocation5 + $0x8] sm:$0xff]  ;;  %v55_v4 = vld [vmem:[#allocation5 + $0x10] sm:$0xff]  ;;  %v56_v6 = vld [vmem:[#allocation5 + $0x18] sm:$0xff]  ;;  %vm64_vm1 = vcmask 261120   ;;  %s308_s2 = smov [#allocation8]  }
  0x39   :  { %v188_v5 = vpack.c.bf16 %v54_v3, %v53_v2  ;;  %v191_v7 = vpack.c.bf16 %v56_v6, %v55_v4  ;;  %v52_v8 = vld [vmem:[#allocation2] sm:$0xff]  ;;  %v169_v9 = vld [vmem:[#allocation7] ss:$0 sm:$0xff]  ;;  %s159_s22 = sshll.u32 %s308_s2, 4  ;;  %s160_s22 = int_to_ptr.vmem [resolvable:$true] %s159_s22 }
  0x3a   :  { %s272_s23 = scalar_lea.vmem %s160_s22, 128  ;;  %p277_p11 = scmp.lt.s32.totalorder %s160_s22, %s160_s22 }
  0x3b   :  { %189 = vmatpush3.bf16.msra.mxu0 %v188_v5  ;;  %p273_p10 = scmp.ne.s32.totalorder %s160_s22, %s272_s23  ;;  %p278_p12 = scmp.lt.s32.totalorder %s272_s23, %s272_s23 }
  0x3c   :  { %190 = vmatprep.subr.bf16.mxu0 %v305_v0 }
  0x3d   :  { %p279_p13 = por %p278_p12, %p277_p11 }
  0x3f   :  { %192 = vmatpush3.bf16.msra.mxu0 %v191_v7  ;;  %p280_p0 = pnand %p279_p13, %p273_p10 }
  0x42   :  { %185 = vmatmul.mubr.msk.f32.vlgmr.msra.gmra.mrb[0].mxu0 %vm64_vm1, %v52_v8 }
 0x115   :  { %v134_v10 = vpop.f32.mrb[0].mxu0 }
 0x116   :  { %v135_v11 = vadd.f32 %v169_v9, %v134_v10  ;;  %v186_v12 = vpop.f32.mrb[1].mxu0 }
 0x118   :  { %v139_v13 = vmin.f32 %v135_v11, 20.0  ;;  %vm138_vm3 = vcmp.gt.f32.partialorder %v135_v11, 20.0 }
 0x11a   :  { %v140_v14 = vmul.f32 1.442695, %v139_v13 }
 0x11c   :  { %202 = vpow2.f32 %v140_v14 }
 0x126   :  { %v203_v15 = vpop.eup %202 }
 0x127   :  { %v142_v16 = vadd.f32 1.0, %v203_v15  ;;  %v145_v17 = vmul.f32 -0.5, %v203_v15  ;;  %v148_v19 = vand.u32 2147483647, %v203_v15 }
 0x129   :  { %204 = vlog2.f32 %v142_v16  ;;  %v146_v18 = vadd.f32 1.0, %v145_v17  ;;  %vm149_vm2 = vcmp.lt.f32.partialorder %v148_v19, 0.0004427343 }
 0x12b   :  { %v147_v22 = vmul.f32 %v203_v15, %v146_v18 }
 0x133   :  { %v205_v20 = vpop.eup %204 }
 0x134   :  { %v144_v21 = vmul.f32 0.6931472, %v205_v20 }
 0x136   :  { %v150_v23 = vsel %vm149_vm2, %v147_v22, %v144_v21 }
 0x137   :  { %v151_v24 = vsel %vm138_vm3, %v135_v11, %v150_v23 }
 0x138   :  { %152 = vst [vmem:[#allocation8] sm:$0xff] %v151_v24 }
 0x139   :  { %283 = shalt.err (!%p280_p0)
}
 0x13a   :  { %s284_s26 = scalar_lea.hbm %s380_s3, 128 }
 0x13b   :  { %p285_p1 = scmp.ne.s32.totalorder %s380_s3, %s284_s26  ;;  %p288_p2 = scmp.lt.u32.totalorder %s284_s26, %s380_s3 }
 0x13d   :  { %p290_p3 = pnand %p288_p2, %p285_p1 }
 0x13f   :  { %293 = shalt.err (!%p290_p3)
}
 0x140   :  { %162 = dma.vmem_to_hbm [thread:$0]  %s160_s22, 128, %s380_s3, [#allocation4]  }
 0x141   :  { %298 = dma.done.wait [#allocation4], 128  }
 0x142   :  { %299 = vsyncadd [#allocation4], 4294967168 }
 0x143   :  { %166 = vsyncpa [#allocation3], 1 }
 0x144   :  { %167 = vsyncpa [#allocation6], 1 }
 0x145   :  { %168 = vsyncpa [#allocation4], 1 }

</bundles_post_ra>
